<compile_context>
chip_gen: v7x
topology: tpu7x:2x2x1
jax: 0.10.0
libtpu: 0.0.40
codegen_flags: <defaults>
</compile_context>

<pallas_src>
import functools

import numpy as np

import jax
import jax.numpy as jnp
from jax.experimental import pallas as pl
from jax.experimental.pallas import tpu as pltpu

EPS = 1e-5  # torch BatchNorm1d default


def _round_up(n, m):
    return ((n + m - 1) // m) * m


def _pick_tile_b(batch):
    """Largest batch tile giving >=2 grid steps (for megacore), 128-lane aligned."""
    for t in (2048, 1024, 512, 256, 128):
        if batch % t == 0 and batch // t >= 2:
            return t
    return batch  # single tile; full-dim blocks are always legal


def _critic_kernel(layout, n_layers, h0_dim, a_dim,
                   bn_ref, x_ref, a_ref, p_ref, out_ref, cat_ref):
    """One batch-tile of the Critic forward pass, fully VMEM resident.

    layout: name -> (row_start, n_rows, n_cols) static ints into packed params.
    Row starts are multiples of 8; column counts are multiples of 128 (except
    the scalar final bias), so every weight slice is an aligned lane tile.
    """

    def blk(name):
        r0, nr, nc = layout[name]
        return p_ref[r0:r0 + nr, :nc]

    # --- BatchNorm1d: gamma/beta are folded into W0/b0 at pack time; batch
    # statistics come in pre-computed (full batch) as scale/shift rows. ---
    scale = bn_ref[0:1, :]
    shift = bn_ref[1:2, :]
    xn = x_ref[...] * scale + shift

    # --- layer 0: Linear(S, H0) + relu. Output width is already padded to the
    # concat width, with exact zeros in lanes [H0:], so `a` can be dropped in. ---
    h = jnp.maximum(
        jnp.dot(xn, blk("W0"), preferred_element_type=jnp.float32) + blk("b0"), 0.0)

    # --- layer 1: cat([h, a]) @ W1 as a single matmul. Place `a` into lanes
    # [H0:H0+A] of the scratch activation (in-VMEM masked store, no HBM concat),
    # then one dot against the stacked [W1x; W1a] block. ---
    cat_ref[...] = h
    cat_ref[:, h0_dim:h0_dim + a_dim] = a_ref[...]
    h = jnp.maximum(
        jnp.dot(cat_ref[...], blk("W1"), preferred_element_type=jnp.float32)
        + blk("b1"), 0.0)

    # --- extra hidden layers ---
    for i in range(2, n_layers):
        h = jnp.maximum(
            jnp.dot(h, blk(f"W{i}"), preferred_element_type=jnp.float32)
            + blk(f"b{i}"), 0.0)

    # --- final layer: Linear(H_last, 1). Computed as (8, P) x (P, TILE_B) so
    # the result is a lane-dense row (one unmasked vst) instead of a (TILE_B, 1)
    # column of masked stores. Rows 1..7 of the Wlast block are zeros. ---
    wl = blk("Wlast")                                              # (8, P_last)
    q = jnp.dot(wl, h.T, preferred_element_type=jnp.float32)       # (8, TILE_B)
    out_ref[...] = q[0:1, :] + blk("blast")                        # (1, TILE_B)


def pack_critic_params(params, state_size, action_size, fc_layer_sizes):
    """Fold BN affine into layer 0 and pack all params into one padded buffer.

    Done once per parameter set, host-side in numpy (no per-call device ops).
    Every block: rows start at a multiple of 8, columns padded to 128, with the
    zero padding arranged so padded activation lanes stay exactly zero.
    Returns (packed np.float32 [R, C], layout: name -> (row_start, rows, cols)).
    """
    f32 = np.float32
    S, A = state_size, action_size
    H = list(fc_layer_sizes)
    n_layers = len(H)
    H0 = H[0]

    gamma = np.asarray(params["gamma"], f32).reshape(1, S)
    beta = np.asarray(params["beta"], f32).reshape(1, S)
    W0 = np.asarray(params["W0"], f32)                      # (S, H0)
    b0 = np.asarray(params["b0"], f32).reshape(1, H0)
    # Fold BatchNorm gamma/beta into layer 0: W0' = diag(gamma) W0, b0' = b0 + beta W0
    W0f = gamma.reshape(S, 1) * W0
    b0f = b0 + beta @ W0

    PC = _round_up(H0 + A, 128)                             # concat (layer-1 input) width
    PH = [_round_up(h, 128) for h in H]                     # padded hidden widths

    blocks = []                                             # (name, canvas, nr, nc)

    def add(name, canvas, nr, nc):
        blocks.append((name, canvas, nr, nc))

    c = np.zeros((S, PC), f32); c[:, :H0] = W0f
    add("W0", c, S, PC)
    c = np.zeros((1, PC), f32); c[0, :H0] = b0f[0]
    add("b0", c, 1, PC)

    W1x = np.asarray(params["W1x"], f32)                    # (H0, H1)
    W1a = np.asarray(params["W1a"], f32)                    # (A, H1)
    b1 = np.asarray(params["b1"], f32).reshape(1, H[1])
    c = np.zeros((PC, PH[1]), f32)
    c[:H0, :H[1]] = W1x
    c[H0:H0 + A, :H[1]] = W1a
    add("W1", c, PC, PH[1])
    c = np.zeros((1, PH[1]), f32); c[0, :H[1]] = b1[0]
    add("b1", c, 1, PH[1])

    for i in range(2, n_layers):
        Wi = np.asarray(params[f"W{i}"], f32)               # (H[i-1], H[i])
        bi = np.asarray(params[f"b{i}"], f32).reshape(1, H[i])
        c = np.zeros((PH[i - 1], PH[i]), f32); c[:H[i - 1], :H[i]] = Wi
        add(f"W{i}", c, PH[i - 1], PH[i])
        c = np.zeros((1, PH[i]), f32); c[0, :H[i]] = bi[0]
        add(f"b{i}", c, 1, PH[i])

    Wl = np.asarray(params["Wlast"], f32).reshape(H[-1], 1)
    bl = np.asarray(params["blast"], f32).reshape(1, 1)
    c = np.zeros((8, PH[-1]), f32); c[0, :H[-1]] = Wl[:, 0]  # rows 1..7 stay zero
    add("Wlast", c, 8, PH[-1])
    add("blast", bl.copy(), 1, 1)

    C = _round_up(max(nc for _, _, _, nc in blocks), 128)
    layout, rows, r = {}, [], 0
    for name, canvas, nr, nc in blocks:
        ra = _round_up(canvas.shape[0], 8)
        padded = np.zeros((ra, C), f32)
        padded[:canvas.shape[0], :canvas.shape[1]] = canvas
        layout[name] = (r, nr, nc)
        rows.append(padded)
        r += ra
    packed = np.concatenate(rows, axis=0)
    return packed, layout


def make_critic_forward(params, state_size, action_size, fc_layer_sizes):
    """Pack params once and return a jitted forward(x, a) -> (B, 1)."""
    packed_np, layout = pack_critic_params(params, state_size, action_size,
                                           fc_layer_sizes)
    packed = jnp.asarray(packed_np)
    n_layers = len(fc_layer_sizes)
    H0, A, S = fc_layer_sizes[0], action_size, state_size
    PC = layout["W1"][1]                     # padded concat width (rows of W1 block)
    kernel = functools.partial(_critic_kernel, layout, n_layers, H0, A)

    @jax.jit
    def forward(x, a):
        B = x.shape[0]
        tile_b = _pick_tile_b(B)
        n_tiles = B // tile_b

        # Full-batch BatchNorm statistics (training mode, biased variance),
        # computed once here so the batch tiles below stay globally correct.
        mean = jnp.mean(x, axis=0, keepdims=True)
        xc = x - mean
        var = jnp.mean(xc * xc, axis=0, keepdims=True)
        scale = jax.lax.rsqrt(var + EPS)
        bn = jnp.concatenate([scale, -mean * scale], axis=0)   # (2, S)

        flops = 2 * B * (S * H0
                         + (H0 + A) * fc_layer_sizes[1]
                         + sum(fc_layer_sizes[i - 1] * fc_layer_sizes[i]
                               for i in range(2, n_layers))
                         + fc_layer_sizes[-1])
        bytes_accessed = 4 * (x.size + a.size + 2 * S + int(packed.size) + B)

        q_row = pl.pallas_call(
            kernel,
            out_shape=jax.ShapeDtypeStruct((1, B), jnp.float32),
            grid=(n_tiles,),
            in_specs=[
                pl.BlockSpec((2, S), lambda i: (0, 0)),            # BN scale/shift
                pl.BlockSpec((tile_b, S), lambda i: (i, 0)),       # states
                pl.BlockSpec((tile_b, A), lambda i: (i, 0)),       # actions
                pl.BlockSpec(packed.shape, lambda i: (0, 0)),      # packed params
            ],
            out_specs=pl.BlockSpec((1, tile_b), lambda i: (0, i)), # lane-dense row
            scratch_shapes=[pltpu.VMEM((tile_b, PC), jnp.float32)],
            compiler_params=pltpu.CompilerParams(
                dimension_semantics=("parallel",)),
            cost_estimate=pl.CostEstimate(
                flops=flops, transcendentals=0, bytes_accessed=bytes_accessed),
        )(bn, x, a, packed)
        return q_row.reshape(B, 1)           # torch-style (B, 1) output

    return forward


def init_critic_params(key, state_size, action_size, fc_layer_sizes):
    """Deterministic init mirroring the PyTorch module's reset_parameters().

    hidden_init uses weight.size()[0] == out_features -> lim = 1/sqrt(out_features).
    Biases use torch's default Linear init: uniform(-1/sqrt(in), 1/sqrt(in)).
    Weights stored as (in_features, out_features).
    """
    params = {}
    params["gamma"] = jnp.ones((1, state_size), jnp.float32)   # BatchNorm1d weight
    params["beta"] = jnp.zeros((1, state_size), jnp.float32)   # BatchNorm1d bias

    def linear(key, fan_in, fan_out, w_lim):
        kw, kb = jax.random.split(key)
        W = jax.random.uniform(kw, (fan_in, fan_out), jnp.float32, -w_lim, w_lim)
        b_lim = 1.0 / jnp.sqrt(jnp.float32(fan_in))
        b = jax.random.uniform(kb, (1, fan_out), jnp.float32, -b_lim, b_lim)
        return W, b

    keys = jax.random.split(key, len(fc_layer_sizes) + 1)

    H0 = fc_layer_sizes[0]
    params["W0"], params["b0"] = linear(keys[0], state_size, H0,
                                        1.0 / jnp.sqrt(jnp.float32(H0)))

    H1 = fc_layer_sizes[1]
    W1, b1 = linear(keys[1], H0 + action_size, H1, 1.0 / jnp.sqrt(jnp.float32(H1)))
    params["W1x"], params["W1a"], params["b1"] = W1[:H0], W1[H0:], b1

    for i in range(2, len(fc_layer_sizes)):
        Hi_in, Hi_out = fc_layer_sizes[i - 1], fc_layer_sizes[i]
        params[f"W{i}"], params[f"b{i}"] = linear(
            keys[i], Hi_in, Hi_out, 1.0 / jnp.sqrt(jnp.float32(Hi_out)))

    params["Wlast"], params["blast"] = linear(keys[-1], fc_layer_sizes[-1], 1, 3e-3)
    return params


def critic_reference(x, a, params, fc_layer_sizes):
    """Pure-JAX reference (unfused, unfolded) for correctness checking."""
    mean = jnp.mean(x, axis=0, keepdims=True)
    var = jnp.mean((x - mean) ** 2, axis=0, keepdims=True)
    xn = (x - mean) / jnp.sqrt(var + EPS) * params["gamma"] + params["beta"]
    h = jax.nn.relu(xn @ params["W0"] + params["b0"])
    h = jnp.concatenate([h, a], axis=-1)
    W1 = jnp.concatenate([params["W1x"], params["W1a"]], axis=0)
    h = jax.nn.relu(h @ W1 + params["b1"])
    for i in range(2, len(fc_layer_sizes)):
        h = jax.nn.relu(h @ params[f"W{i}"] + params[f"b{i}"])
    return h @ params["Wlast"] + params["blast"]


if __name__ == "__main__":
    state_size, action_size = 16, 8
    fc_layer_sizes = [32, 32, 32]
    batch = 256  # multiple of 128 -> exercises the 2-tile parallel batch grid

    key = jax.random.PRNGKey(0)
    kx, ka, kp, kg, kb = jax.random.split(key, 5)
    x = jax.random.normal(kx, (batch, state_size), jnp.float32)
    a = jax.random.normal(ka, (batch, action_size), jnp.float32)
    params = init_critic_params(kp, state_size, action_size, fc_layer_sizes)

    # Perturb BN affine params away from (1, 0) so the fold-into-layer-0
    # optimization path is actually exercised by the correctness check.
    params["gamma"] = 1.0 + 0.1 * jax.random.normal(kg, (1, state_size), jnp.float32)
    params["beta"] = 0.1 * jax.random.normal(kb, (1, state_size), jnp.float32)

    # Packing happens once here (hoisted out of the forward path); the returned
    # callable is jitted and only takes (x, a).
    critic_forward = make_critic_forward(params, state_size, action_size,
                                         fc_layer_sizes)

    q = critic_forward(x, a)
    q = jax.block_until_ready(q)

    q_ref = critic_reference(x, a, params, fc_layer_sizes)
    assert q.shape == (batch, 1), q.shape
    assert jnp.allclose(q, q_ref, atol=1e-4, rtol=1e-4), (q, q_ref)

    print("KERNEL_OK")
</pallas_src>

<mosaic_0001>
module attributes {stable_mosaic.version = 11 : i64} {
  func.func @_critic_kernel(%arg0: i32, %arg1: memref<2x16xf32, #tpu.memory_space<vmem>>, %arg2: memref<128x16xf32, #tpu.memory_space<vmem>>, %arg3: memref<128x8xf32, #tpu.memory_space<vmem>>, %arg4: memref<312x128xf32, #tpu.memory_space<vmem>>, %arg5: memref<1x128xf32, #tpu.memory_space<vmem>>, %arg6: memref<128x128xf32, #tpu.memory_space<vmem>>) attributes {dimension_semantics = [#tpu.dimension_semantics<parallel>], iteration_bounds = array<i64: 2>, scalar_prefetch = 0 : i64, scratch_operands = 1 : i64, tpu.core_type = #tpu.core_type<tc>, window_params = [{pipeline_mode = #tpu.pipeline_mode<synchronous>, transform_indices = @transform_0, window_bounds = array<i64: 2, 16>}, {transform_indices = @transform_1, window_bounds = array<i64: 128, 16>}, {transform_indices = @transform_2, window_bounds = array<i64: 128, 8>}, {pipeline_mode = #tpu.pipeline_mode<synchronous>, transform_indices = @transform_3, window_bounds = array<i64: 312, 128>}, {transform_indices = @transform_4, window_bounds = array<i64: 1, 128>}]} {
    %c0 = arith.constant 0 : index
    %c0_0 = arith.constant 0 : index
    %0 = vector.load %arg1[%c0, %c0_0] : memref<2x16xf32, #tpu.memory_space<vmem>>, vector<1x16xf32>
    %c1 = arith.constant 1 : index
    %c0_1 = arith.constant 0 : index
    %1 = vector.load %arg1[%c1, %c0_1] : memref<2x16xf32, #tpu.memory_space<vmem>>, vector<1x16xf32>
    %c0_2 = arith.constant 0 : index
    %c0_3 = arith.constant 0 : index
    %2 = vector.load %arg2[%c0_2, %c0_3] : memref<128x16xf32, #tpu.memory_space<vmem>>, vector<128x16xf32>
    %3 = vector.broadcast %0 : vector<1x16xf32> to vector<128x16xf32>
    %4 = arith.mulf %2, %3 : vector<128x16xf32>
    %5 = vector.broadcast %1 : vector<1x16xf32> to vector<128x16xf32>
    %6 = arith.addf %4, %5 : vector<128x16xf32>
    %c0_4 = arith.constant 0 : index
    %c0_5 = arith.constant 0 : index
    %7 = vector.load %arg4[%c0_4, %c0_5] : memref<312x128xf32, #tpu.memory_space<vmem>>, vector<16x128xf32>
    %cst = arith.constant dense<0.000000e+00> : vector<128x128xf32>
    %8 = tpu.matmul %6, %7, %cst {dimension_numbers = #tpu.dot_dimension_numbers<[1], [0], [0], [1], [0, 0, 1, 1], [], []>} : vector<128x16xf32>, vector<16x128xf32>, vector<128x128xf32> -> vector<128x128xf32>
    %c16 = arith.constant 16 : index
    %c0_6 = arith.constant 0 : index
    %9 = vector.load %arg4[%c16, %c0_6] : memref<312x128xf32, #tpu.memory_space<vmem>>, vector<1x128xf32>
    %10 = vector.broadcast %9 : vector<1x128xf32> to vector<128x128xf32>
    %11 = arith.addf %8, %10 : vector<128x128xf32>
    %cst_7 = arith.constant 0.000000e+00 : f32
    %12 = vector.broadcast %cst_7 : f32 to vector<128x128xf32>
    %13 = arith.maximumf %11, %12 : vector<128x128xf32>
    %c0_8 = arith.constant 0 : index
    %c0_9 = arith.constant 0 : index
    %14 = vector.load %arg6[%c0_8, %c0_9] : memref<128x128xf32, #tpu.memory_space<vmem>>, vector<128x128xf32>
    tpu.vector_store %arg6[%c0_8, %c0_9], %13 {strides = array<i32>} : memref<128x128xf32, #tpu.memory_space<vmem>>, vector<128x128xf32>,
    %c0_10 = arith.constant 0 : index
    %c0_11 = arith.constant 0 : index
    %15 = vector.load %arg3[%c0_10, %c0_11] : memref<128x8xf32, #tpu.memory_space<vmem>>, vector<128x8xf32>
    %c0_12 = arith.constant 0 : index
    %c32 = arith.constant 32 : index
    %16 = vector.load %arg6[%c0_12, %c32] : memref<128x128xf32, #tpu.memory_space<vmem>>, vector<128x8xf32>
    tpu.vector_store %arg6[%c0_12, %c32], %15 {strides = array<i32>} : memref<128x128xf32, #tpu.memory_space<vmem>>, vector<128x8xf32>,
    %c0_13 = arith.constant 0 : index
    %c0_14 = arith.constant 0 : index
    %17 = vector.load %arg6[%c0_13, %c0_14] : memref<128x128xf32, #tpu.memory_space<vmem>>, vector<128x128xf32>
    %c24 = arith.constant 24 : index
    %c0_15 = arith.constant 0 : index
    %18 = vector.load %arg4[%c24, %c0_15] : memref<312x128xf32, #tpu.memory_space<vmem>>, vector<128x128xf32>
    %cst_16 = arith.constant dense<0.000000e+00> : vector<128x128xf32>
    %19 = tpu.matmul %17, %18, %cst_16 {dimension_numbers = #tpu.dot_dimension_numbers<[1], [0], [0], [1], [0, 0, 1, 1], [], []>} : vector<128x128xf32>, vector<128x128xf32>, vector<128x128xf32> -> vector<128x128xf32>
    %c152 = arith.constant 152 : index
    %c0_17 = arith.constant 0 : index
    %20 = vector.load %arg4[%c152, %c0_17] : memref<312x128xf32, #tpu.memory_space<vmem>>, vector<1x128xf32>
    %21 = vector.broadcast %20 : vector<1x128xf32> to vector<128x128xf32>
    %22 = arith.addf %19, %21 : vector<128x128xf32>
    %cst_18 = arith.constant 0.000000e+00 : f32
    %23 = vector.broadcast %cst_18 : f32 to vector<128x128xf32>
    %24 = arith.maximumf %22, %23 : vector<128x128xf32>
    %c160 = arith.constant 160 : index
    %c0_19 = arith.constant 0 : index
    %25 = vector.load %arg4[%c160, %c0_19] : memref<312x128xf32, #tpu.memory_space<vmem>>, vector<128x128xf32>
    %cst_20 = arith.constant dense<0.000000e+00> : vector<128x128xf32>
    %26 = tpu.matmul %24, %25, %cst_20 {dimension_numbers = #tpu.dot_dimension_numbers<[1], [0], [0], [1], [0, 0, 1, 1], [], []>} : vector<128x128xf32>, vector<128x128xf32>, vector<128x128xf32> -> vector<128x128xf32>
    %c288 = arith.constant 288 : index
    %c0_21 = arith.constant 0 : index
    %27 = vector.load %arg4[%c288, %c0_21] : memref<312x128xf32, #tpu.memory_space<vmem>>, vector<1x128xf32>
    %28 = vector.broadcast %27 : vector<1x128xf32> to vector<128x128xf32>
    %29 = arith.addf %26, %28 : vector<128x128xf32>
    %cst_22 = arith.constant 0.000000e+00 : f32
    %30 = vector.broadcast %cst_22 : f32 to vector<128x128xf32>
    %31 = arith.maximumf %29, %30 : vector<128x128xf32>
    %c296 = arith.constant 296 : index
    %c0_23 = arith.constant 0 : index
    %32 = vector.load %arg4[%c296, %c0_23] : memref<312x128xf32, #tpu.memory_space<vmem>>, vector<8x128xf32>
    %33 = tpu.transpose %31, [1, 0] : vector<128x128xf32> -> vector<128x128xf32>
    %cst_24 = arith.constant dense<0.000000e+00> : vector<8x128xf32>
    %34 = tpu.matmul %32, %33, %cst_24 {dimension_numbers = #tpu.dot_dimension_numbers<[1], [0], [0], [1], [0, 0, 1, 1], [], []>} : vector<8x128xf32>, vector<128x128xf32>, vector<8x128xf32> -> vector<8x128xf32>
    %35 = vector.extract_strided_slice %34 {offsets = [0, 0], sizes = [1, 128], strides = [1, 1]} : vector<8x128xf32> to vector<1x128xf32>
    %c304 = arith.constant 304 : index
    %c0_25 = arith.constant 0 : index
    %36 = vector.load %arg4[%c304, %c0_25] : memref<312x128xf32, #tpu.memory_space<vmem>>, vector<1x1xf32>
    %37 = vector.broadcast %36 : vector<1x1xf32> to vector<1x128xf32>
    %38 = arith.addf %35, %37 : vector<1x128xf32>
    %c0_26 = arith.constant 0 : index
    %c0_27 = arith.constant 0 : index
    %39 = vector.load %arg5[%c0_26, %c0_27] : memref<1x128xf32, #tpu.memory_space<vmem>>, vector<1x128xf32>
    tpu.vector_store %arg5[%c0_26, %c0_27], %38 {strides = array<i32>} : memref<1x128xf32, #tpu.memory_space<vmem>>, vector<1x128xf32>,
    return
  }
  func.func @transform_0(%arg0: i32) -> (i32, i32) {
    %c0_i32 = arith.constant 0 : i32
    %c0_i32_0 = arith.constant 0 : i32
    %c0_i32_1 = arith.constant 0 : i32
    return %c0_i32, %c0_i32_0 : i32, i32
  }
  func.func @transform_1(%arg0: i32) -> (i32, i32) {
    %c0_i32 = arith.constant 0 : i32
    %c0_i32_0 = arith.constant 0 : i32
    return %arg0, %c0_i32 : i32, i32
  }
  func.func @transform_2(%arg0: i32) -> (i32, i32) {
    %c0_i32 = arith.constant 0 : i32
    %c0_i32_0 = arith.constant 0 : i32
    return %arg0, %c0_i32 : i32, i32
  }
  func.func @transform_3(%arg0: i32) -> (i32, i32) {
    %c0_i32 = arith.constant 0 : i32
    %c0_i32_0 = arith.constant 0 : i32
    %c0_i32_1 = arith.constant 0 : i32
    return %c0_i32, %c0_i32_0 : i32, i32
  }
  func.func @transform_4(%arg0: i32) -> (i32, i32) {
    %c0_i32 = arith.constant 0 : i32
    %c0_i32_0 = arith.constant 0 : i32
    return %c0_i32, %arg0 : i32, i32
  }
}

</mosaic_0001>

<bundles_post_ra>
// kernel: forward.1
= control target key start
LH: loop header
LB: loop body
LE: loop exit
PB: predicated region body
PF: predicated region fallthrough
CT: control target
= control target key end

     0   :  { %9 = vsyncpa [#allocation4], 0  ;;  %s2055_s0 = inlined_call_operand.vmem [shape: f32[2,16], index: 0, kind: input, shape index: {}]   ;;  %s2056_s1 = inlined_call_operand.vmem [shape: f32[256,16], index: 1, kind: input, shape index: {}]   ;;  %s2057_s2 = inlined_call_operand.vmem [shape: f32[256,8], index: 2, kind: input, shape index: {}]   ;;  %s2058_s3 = inlined_call_operand.vmem [shape: f32[312,128], index: 3, kind: input, shape index: {}]   ;;  %s2059_s4 = inlined_call_operand.hbm [shape: f32[1,256], index: 4, kind: output, shape index: {}]  }
   0x1   :  { %11 = vsyncpa [#allocation4 + $0x1], 0  ;;  %s1684_s15 = smov 0   ;;  %s1686_s16 = smov 0  }
   0x2   :  { %s1688_s17 = smov 0   ;;  %s1690_s18 = smov 0  }
   0x3 LB: > { %s1145_s19 = sadd.s32 4294967295, %s1651_s18   ;;  %s1146_s20 = sadd.s32 4294967294, %s1651_s18   ;;  %s1651_s18 = sphi %s1690_s18, %s2065_s18   ;;  %s1647_s17 = sphi %s1688_s17, %s2064_s17   ;;  %s1643_s16 = sphi %s1686_s16, %s2063_s16   ;;  %s1639_s15 = sphi %s1684_s15, %s2062_s15  }
   0x4   : > { %s1707_s21 = sadd.s32 1, %s1651_s18   ;;  %s118_s22 = sadd.s32 1, %s1647_s17 }
   0x5   : > { %s115_s23 = ssub.s32 %s1651_s18, %s1707_s21  ;;  %p128_p0 = scmp.ne.s32.totalorder %s1647_s17, %s1643_s16 }
   0x6   : > { %p116_p1 = scmp.eq.s32.totalorder %s115_s23, 0  ;;  %p129_p2 = scmp.eq.s32.totalorder %s1145_s19, 1 }
   0x7   : > { %p134_p3 = scmp.ne.s32.totalorder %s1643_s16, %s1639_s15  ;;  %p135_p4 = scmp.eq.s32.totalorder %s1146_s20, 1 }
   0x8   : > { %s1717_s24 = scalar_select %p116_p1, %s1647_s17, %s118_s22  }
   0x9   : > { %p1719_p5 = por %p129_p2, %p128_p0  ;;  %p1723_p6 = por %p135_p4, %p134_p3 }
   0xa   : > { %p1149_p7 = scmp.ge.s32.totalorder %s1651_s18, 1  ;;  %p177_p8 = scmp.lt.s32.totalorder %s1651_s18, 3 }
   0xc   : > { %p178_p9 = pnand %p1149_p7, %p177_p8 }
   0xd   : > { %v277_v0 = vld [vmem:[%s2058_s3] sm:$0xff] (!%p178_p9)  ;;  %v278_v1 = vld [vmem:[%s2058_s3 + $0x8] sm:$0xff] (!%p178_p9)  ;;  %s1735_s5 = sshll.u32 (!%p178_p9), %s1145_s19, 4  ;;  %v623_v3 = vld [vmem:[%s2058_s3 + $0x18] sm:$0xff] (!%p178_p9)  ;;  %vm284_vm0 = vcmask (!%p178_p9), 130048   ;;  %s1653_s22 = smov (!%p178_p9), 32  }
   0xe   : > { %181 = sbr.rel (%p178_p9) target bundleno = 986 (0x3da), region = 36  ;;  %v1452_v2 = vpack.c.bf16 (!%p178_p9), %v278_v1, %v277_v0  ;;  %p208_p10 = scmp.lt.s32.totalorder (!%p178_p9), %s1735_s5, 31  ;;  %v624_v4 = vld [vmem:[%s2058_s3 + $0x20] sm:$0xff] (!%p178_p9)  ;;  %v625_v6 = vld [vmem:[%s2058_s3 + $0x28] sm:$0xff] (!%p178_p9)  ;;  %v626_v7 = vld [vmem:[%s2058_s3 + $0x30] sm:$0xff] (!%p178_p9)  ;;  %vm590_vm1 = vcmask (!%p178_p9), 326912  }
   0xf   : > { %v1456_v5 = vpack.c.bf16 (!%p178_p9), %v624_v4, %v623_v3  ;;  %v1460_v8 = vpack.c.bf16 (!%p178_p9), %v626_v7, %v625_v6  ;;  %v627_v9 = vld [vmem:[%s2058_s3 + $0x38] sm:$0xff] (!%p178_p9)  ;;  %v628_v10 = vld [vmem:[%s2058_s3 + $0x40] sm:$0xff] (!%p178_p9)  ;;  %v629_v28 = vld [vmem:[%s2058_s3 + $0x48] sm:$0xff] (!%p178_p9)  ;;  %vm1655_vm2 = vmmov (!%p178_p9), 0   ;;  %s205_s8 = sand.u32 (!%p178_p9), 1, %s1643_s16   ;;  %s2013_s13 = scalar_lea.hbm (!%p178_p9), %s2059_s4, %s1735_s5 }
  0x10   : > { %1453 = vmatprep.subr.bf16.mxu0 (!%p178_p9), %v1452_v2  ;;  %v1760_v11 = vld [vmem:[%s2055_s0] ss:$0 sm:$0xff] (!%p178_p9)  ;;  %v1770_v12 = vld [vmem:[%s2055_s0 + $0x1] ss:$0 sm:$0xff] (!%p178_p9)  ;;  %v1464_v13 = vpack.c.bf16 (!%p178_p9), %v628_v10, %v627_v9  ;;  %v630_v29 = vld [vmem:[%s2058_s3 + $0x50] sm:$0xff] (!%p178_p9)  ;;  %s206_s9 = scalar_lea.vmem (!%p178_p9), [#allocation3], %s205_s8 }
  0x11   : > { %1455 = vmatpush3.bf16.msra.mxu0 (!%p178_p9), %v1452_v2  ;;  %1457 = vmatprep.subr.bf16.mxu1 (!%p178_p9), %v1456_v5  ;;  %v1468_v35 = vpack.c.bf16 (!%p178_p9), %v630_v29, %v629_v28  ;;  %v805_v29 = vld [vmem:[%s2058_s3 + $0xa0] sm:$0xff] (!%p178_p9)  ;;  %s1079_s10 = sshll.u32 (!%p178_p9), %s206_s9, 4  ;;  %s1658_s20 = smov (!%p178_p9), [#allocation3]   ;;  %s2015_s10 = int_to_ptr.vmem [resolvable:$true] %s1079_s10 }
  0x12   : > { %1459 = vmatpush3.bf16.msra.mxu1 (!%p178_p9), %v1456_v5  ;;  %s1589_s19 = scalar_lea.vmem (!%p178_p9), %s2015_s10, 16 }
  0x13   : > { %1461 = vmatprep.subr.bf16.mxu1 (!%p178_p9), %v1460_v8  ;;  %p1590_p11 = scmp.ne.s32.totalorder (!%p178_p9), %s2015_s10, %s1589_s19 }
  0x15   : > { %s209_s14 = scalar_select %p208_p10, %s1735_s5, 31 }
  0x16   : > { %1463 = vmatpush3.bf16.msra.mxu1 %v1460_v8  ;;  %p1591_p12 = pnand %p1590_p11, %p1719_p5 }
  0x17   : > { %s1151_s27 = sshll.u32 %s209_s14, 3  ;;  %1465 = vmatprep.subr.bf16.mxu1 %v1464_v13  ;;  %s1067_s14 = scalar_lea.sflag [#allocation4], %s205_s8 }
  0x18   : > { %s1765_s7 = scalar_lea.vmem %s2056_s1, %s1151_s27  ;;  %s1784_s12 = scalar_lea.vmem %s2057_s2, %s1151_s27 }
  0x19   : > { %v221_v14 = vld [vmem:[%s1765_s7] sm:$0xff]  ;;  %v222_v15 = vld [vmem:[%s1765_s7 + $0x8] sm:$0xff]  ;;  %v223_v16 = vld [vmem:[%s1765_s7 + $0x10] sm:$0xff]  ;;  %p1592_p13 = pneg %p1591_p12 }
  0x1a   : > { %v241_v17 = vmul.f32 %v1760_v11, %v221_v14  ;;  %v242_v18 = vmul.f32 %v1760_v11, %v222_v15  ;;  %v243_v19 = vmul.f32 %v1760_v11, %v223_v16  ;;  %v224_v20 = vld [vmem:[%s1765_s7 + $0x18] sm:$0xff]  ;;  %v225_v21 = vld [vmem:[%s1765_s7 + $0x20] sm:$0xff]  ;;  %v226_v27 = vld [vmem:[%s1765_s7 + $0x28] sm:$0xff]  ;;  %1467 = vmatpush3.bf16.msra.mxu1 %v1464_v13 }
  0x1b   : > { %v244_v22 = vmul.f32 %v1760_v11, %v224_v20  ;;  %v245_v26 = vmul.f32 %v1760_v11, %v225_v21  ;;  %v227_v30 = vld [vmem:[%s1765_s7 + $0x30] sm:$0xff]  ;;  %v510_v31 = vld [vmem:[%s1784_s12] sm:$0xff]  ;;  %v246_v33 = vmul.f32 %v1760_v11, %v226_v27  ;;  %v228_v38 = vld [vmem:[%s1765_s7 + $0x38] sm:$0xff]  ;;  %1469 = vmatprep.subr.bf16.mxu1 %v1468_v35 }
  0x1c   : > { %v261_v23 = vadd.f32 %v1770_v12, %v241_v17  ;;  %v262_v24 = vadd.f32 %v1770_v12, %v242_v18  ;;  %v263_v25 = vadd.f32 %v1770_v12, %v243_v19  ;;  %v512_v34 = vld [vmem:[%s1784_s12 + $0x10] sm:$0xff]  ;;  %v247_v37 = vmul.f32 %v1760_v11, %v227_v30  ;;  %v229_v39 = vld [vmem:[%s1765_s7 + $0x40] sm:$0xff]  ;;  %542 = vrot.lane.b32.xlu0 %v510_v31, %s1653_s22  ;;  %v511_v40 = vld [vmem:[%s1784_s12 + $0x8] sm:$0xff] }
  0x1d   : > { %v264_v32 = vadd.f32 %v1770_v12, %v244_v22  ;;  %v265_v36 = vadd.f32 %v1770_v12, %v245_v26  ;;  %546 = vrot.lane.b32.xlu1 %v512_v34, %s1653_s22  ;;  %v266_v41 = vadd.f32 %v1770_v12, %v246_v33  ;;  %v248_v42 = vmul.f32 %v1760_v11, %v228_v38  ;;  %v513_v43 = vld [vmem:[%s1784_s12 + $0x18] sm:$0xff]  ;;  %v230_v46 = vld [vmem:[%s1765_s7 + $0x48] sm:$0xff]  ;;  %v231_v47 = vld [vmem:[%s1765_s7 + $0x50] sm:$0xff] }
  0x1e   : > { %1281 = vmatprep.mubr.msk.f32.mxu0 %vm284_vm0, %v261_v23  ;;  %v267_v44 = vadd.f32 %v1770_v12, %v247_v37  ;;  %v249_v45 = vmul.f32 %v1760_v11, %v229_v39  ;;  %v514_v48 = vld [vmem:[%s1784_s12 + $0x20] sm:$0xff]  ;;  %1471 = vmatpush3.bf16.msra.mxu1 %v1468_v35  ;;  %v250_v50 = vmul.f32 %v1760_v11, %v230_v46  ;;  %v515_v51 = vld [vmem:[%s1784_s12 + $0x28] sm:$0xff]  ;;  %v232_v54 = vld [vmem:[%s1765_s7 + $0x58] sm:$0xff] }
  0x1f   : > { %1282 = vmatmul.mubr.msk.f32.vlgmr.msra.gmra.mrb[0].mxu0 %vm284_vm0, %v262_v24  ;;  %v268_v49 = vadd.f32 %v1770_v12, %v248_v42  ;;  %v251_v53 = vmul.f32 %v1760_v11, %v231_v47  ;;  %v233_v55 = vld [vmem:[%s1765_s7 + $0x60] sm:$0xff]  ;;  %v516_v56 = vld [vmem:[%s1784_s12 + $0x30] sm:$0xff]  ;;  %v252_v58 = vmul.f32 %v1760_v11, %v232_v54  ;;  %v517_v59 = vld [vmem:[%s1784_s12 + $0x38] sm:$0xff] }
  0x20   : > { %1284 = vmatprep.mubr.msk.f32.mxu0 %vm284_vm0, %v263_v25  ;;  %544 = vrot.lane.b32.xlu0 %v511_v40, %s1653_s22  ;;  %v269_v52 = vadd.f32 %v1770_v12, %v249_v45  ;;  %v270_v57 = vadd.f32 %v1770_v12, %v250_v50  ;;  %v253_v61 = vmul.f32 %v1760_v11, %v233_v55  ;;  %v234_v62 = vld [vmem:[%s1765_s7 + $0x68] sm:$0xff]  ;;  %v235_v63 = vld [vmem:[%s1765_s7 + $0x70] sm:$0xff]  ;;  %v518_v0 = vld [vmem:[%s1784_s12 + $0x40] sm:$0xff] }
  0x21   : > { %548 = vrot.lane.b32.xlu1 %v513_v43, %s1653_s22  ;;  %v271_v60 = vadd.f32 %v1770_v12, %v251_v53  ;;  %v272_v1 = vadd.f32 %v1770_v12, %v252_v58  ;;  %v254_v2 = vmul.f32 %v1760_v11, %v234_v62  ;;  %v519_v3 = vld [vmem:[%s1784_s12 + $0x48] sm:$0xff]  ;;  %v255_v5 = vmul.f32 %v1760_v11, %v235_v63  ;;  %v236_v6 = vld [vmem:[%s1765_s7 + $0x78] sm:$0xff]  ;;  %v520_v7 = vld [vmem:[%s1784_s12 + $0x50] sm:$0xff] }
  0x22   : > { %v273_v4 = vadd.f32 %v1770_v12, %v253_v61  ;;  %v256_v9 = vmul.f32 %v1760_v11, %v236_v6  ;;  %v521_v10 = vld [vmem:[%s1784_s12 + $0x58] sm:$0xff]  ;;  %v522_v14 = vld [vmem:[%s1784_s12 + $0x60] sm:$0xff]  ;;  %v523_v16 = vld [vmem:[%s1784_s12 + $0x68] sm:$0xff] }
  0x23   : > { %1285 = vmatmul.mubr.msk.f32.gmra.mrb[2].mxu0 %vm284_vm0, %v264_v32  ;;  %v274_v8 = vadd.f32 %v1770_v12, %v254_v2  ;;  %v275_v13 = vadd.f32 %v1770_v12, %v255_v5  ;;  %v524_v11 = vld [vmem:[%s1784_s12 + $0x70] sm:$0xff]  ;;  %v525_v17 = vld [vmem:[%s1784_s12 + $0x78] sm:$0xff]  ;;  %v633_v20 = vld [vmem:[%s2058_s3 + $0x68] sm:$0xff] }
  0x24   : > { %1287 = vmatprep.mubr.msk.f32.mxu0 %vm284_vm0, %v265_v36  ;;  %550 = vrot.lane.b32.xlu0 %v514_v48, %s1653_s22  ;;  %v276_v15 = vadd.f32 %v1770_v12, %v256_v9  ;;  %v631_v18 = vld [vmem:[%s2058_s3 + $0x58] sm:$0xff]  ;;  %v632_v12 = vld [vmem:[%s2058_s3 + $0x60] sm:$0xff]  ;;  %v634_v21 = vld [vmem:[%s2058_s3 + $0x70] sm:$0xff] }
  0x25   : > { %552 = vrot.lane.b32.xlu1 %v515_v51, %s1653_s22  ;;  %v1472_v19 = vpack.c.bf16 %v632_v12, %v631_v18  ;;  %v1476_v22 = vpack.c.bf16 %v634_v21, %v633_v20  ;;  %v635_v23 = vld [vmem:[%s2058_s3 + $0x78] sm:$0xff]  ;;  %v636_v24 = vld [vmem:[%s2058_s3 + $0x80] sm:$0xff]  ;;  %v637_v26 = vld [vmem:[%s2058_s3 + $0x88] sm:$0xff] }
  0x26   : > { %v1480_v25 = vpack.c.bf16 %v636_v24, %v635_v23  ;;  %v638_v27 = vld [vmem:[%s2058_s3 + $0x90] sm:$0xff]  ;;  %v806_v30 = vld [vmem:[%s2058_s3 + $0xa8] sm:$0xff]  ;;  %v808_v33 = vld [vmem:[%s2058_s3 + $0xb8] sm:$0xff] }
  0x27   : > { %1288 = vmatmul.mubr.msk.f32.gmra.mrb[4].mxu0 %vm284_vm0, %v266_v41  ;;  %1473 = vmatprep.subr.bf16.mxu1 %v1472_v19  ;;  %v1484_v28 = vpack.c.bf16 %v638_v27, %v637_v26  ;;  %v807_v31 = vld [vmem:[%s2058_s3 + $0xb0] sm:$0xff]  ;;  %v1488_v32 = vpack.c.bf16 %v806_v30, %v805_v29  ;;  %v809_v35 = vld [vmem:[%s2058_s3 + $0xc0] sm:$0xff]  ;;  %v810_v36 = vld [vmem:[%s2058_s3 + $0xc8] sm:$0xff] }
  0x28   : > { %1290 = vmatprep.mubr.msk.f32.mxu0 %vm284_vm0, %v267_v44  ;;  %554 = vrot.lane.b32.xlu0 %v516_v56, %s1653_s22  ;;  %v1492_v34 = vpack.c.bf16 %v808_v33, %v807_v31  ;;  %v1496_v37 = vpack.c.bf16 %v810_v36, %v809_v35  ;;  %v811_v38 = vld [vmem:[%s2058_s3 + $0xd0] sm:$0xff]  ;;  %v812_v39 = vld [vmem:[%s2058_s3 + $0xd8] sm:$0xff]  ;;  %v813_v41 = vld [vmem:[%s2058_s3 + $0xe0] sm:$0xff] }
  0x29   : > { %556 = vrot.lane.b32.xlu1 %v517_v59, %s1653_s22  ;;  %1475 = vmatpush3.bf16.msra.mxu1 %v1472_v19  ;;  %v1500_v40 = vpack.c.bf16 %v812_v39, %v811_v38  ;;  %v814_v42 = vld [vmem:[%s2058_s3 + $0xe8] sm:$0xff]  ;;  %v815_v44 = vld [vmem:[%s2058_s3 + $0xf0] sm:$0xff]  ;;  %v816_v45 = vld [vmem:[%s2058_s3 + $0xf8] sm:$0xff] }
  0x2a   : > { %1477 = vmatprep.subr.bf16.mxu1 %v1476_v22  ;;  %1489 = vmatprep.subr.bf16.mxu0 %v1488_v32  ;;  %v1504_v43 = vpack.c.bf16 %v814_v42, %v813_v41  ;;  %v1508_v46 = vpack.c.bf16 %v816_v45, %v815_v44  ;;  %v817_v47 = vld [vmem:[%s2058_s3 + $0x100] sm:$0xff]  ;;  %v818_v48 = vld [vmem:[%s2058_s3 + $0x108] sm:$0xff]  ;;  %v1948_v51 = vld [vmem:[%s2058_s3 + $0x10] ss:$0 sm:$0xff] }
  0x2b   : > { %1291 = vmatmul.mubr.msk.f32.gmra.mrb[6].mxu0 %vm284_vm0, %v268_v49  ;;  %v1512_v49 = vpack.c.bf16 %v818_v48, %v817_v47 }
  0x2c   : > { %1293 = vmatprep.mubr.msk.f32.mxu0 %vm284_vm0, %v269_v52  ;;  %558 = vrot.lane.b32.xlu0 %v518_v0, %s1653_s22 }
  0x2d   : > { %560 = vrot.lane.b32.xlu1 %v519_v3, %s1653_s22  ;;  %1479 = vmatpush3.bf16.msra.mxu1 %v1476_v22 }
  0x2e   : > { %1481 = vmatprep.subr.bf16.mxu1 %v1480_v25  ;;  %1491 = vmatpush3.bf16.msra.mxu0 %v1488_v32 }
  0x2f   : > { %1294 = vmatmul.mubr.msk.f32.gmra.mrb[8].mxu0 %vm284_vm0, %v270_v57  ;;  %1493 = vmatprep.subr.bf16.mxu0 %v1492_v34 }
  0x30   : > { %1296 = vmatprep.mubr.msk.f32.mxu0 %vm284_vm0, %v271_v60  ;;  %562 = vrot.lane.b32.xlu0 %v520_v7, %s1653_s22 }
  0x31   : > { %564 = vrot.lane.b32.xlu1 %v521_v10, %s1653_s22  ;;  %1483 = vmatpush3.bf16.msra.mxu1 %v1480_v25 }
  0x32   : > { %1485 = vmatprep.subr.bf16.mxu1 %v1484_v28  ;;  %1495 = vmatpush3.bf16.msra.mxu0 %v1492_v34 }
  0x33   : > { %1297 = vmatmul.mubr.msk.f32.gmra.mrb[10].mxu0 %vm284_vm0, %v272_v1  ;;  %1497 = vmatprep.subr.bf16.mxu0 %v1496_v37 }
  0x34   : > { %1299 = vmatprep.mubr.msk.f32.mxu0 %vm284_vm0, %v273_v4  ;;  %566 = vrot.lane.b32.xlu0 %v522_v14, %s1653_s22 }
  0x35   : > { %568 = vrot.lane.b32.xlu1 %v523_v16, %s1653_s22  ;;  %1487 = vmatpush3.bf16.msra.mxu1 %v1484_v28 }
  0x36   : > { %1499 = vmatpush3.bf16.msra.mxu0 %v1496_v37 }
  0x37   : > { %1300 = vmatmul.mubr.msk.f32.gmra.mrb[12].mxu0 %vm284_vm0, %v274_v8  ;;  %1501 = vmatprep.subr.bf16.mxu0 %v1500_v40 }
  0x38   : > { %1302 = vmatprep.mubr.msk.f32.mxu0 %vm284_vm0, %v275_v13  ;;  %570 = vrot.lane.b32.xlu0 %v524_v11, %s1653_s22 }
  0x39   : > { %572 = vrot.lane.b32.xlu1 %v525_v17, %s1653_s22  ;;  %s1593_s22 = sshll.u32 %s1658_s20, 4  ;;  %s1594_s22 = int_to_ptr.vmem [resolvable:$false] %s1593_s22 }
  0x3a   : > { %1503 = vmatpush3.bf16.msra.mxu0 %v1500_v40  ;;  %s1595_s23 = scalar_lea.vmem %s1594_s22, 32  ;;  %p1596_p0 = scmp.lt.s32.totalorder %s2015_s10, %s1594_s22 }
  0x3b   : > { %1303 = vmatmul.mubr.msk.f32.gmra.mrb[14].mxu0 %vm284_vm0, %v276_v15  ;;  %1505 = vmatprep.subr.bf16.mxu0 %v1504_v43  ;;  %p1597_p1 = scmp.lt.s32.totalorder %s1595_s23, %s1589_s19 }
  0x3d   : > { %p1598_p2 = por %p1597_p1, %p1596_p0 }
  0x3e   : > { %1507 = vmatpush3.bf16.msra.mxu0 %v1504_v43 }
  0x3f   : > { %1509 = vmatprep.subr.bf16.mxu0 %v1508_v46  ;;  %p1599_p3 = pnand %p1598_p2, %p1592_p13 }
  0x42   : > { %1511 = vmatpush3.bf16.msra.mxu0 %v1508_v46 }
  0x43   : > { %1513 = vmatprep.subr.bf16.mxu0 %v1512_v49 }
  0x46   : > { %1515 = vmatpush3.bf16.msra.mxu0 %v1512_v49 }
  0x8e   : > { %v543_v50 = vpop.permute.xlu0 %542 }
  0x8f   : > { %v547_v55 = vpop.permute.xlu1 %546 }
  0x92   : > { %v545_v58 = vpop.permute.xlu0 %544 }
  0x93   : > { %v549_v1 = vpop.permute.xlu1 %548 }
  0x96   : > { %v551_v10 = vpop.permute.xlu0 %550 }
  0x97   : > { %v553_v8 = vpop.permute.xlu1 %552 }
  0x9a   : > { %v555_v20 = vpop.permute.xlu0 %554 }
  0x9b   : > { %v557_v12 = vpop.permute.xlu1 %556 }
  0x9e   : > { %v559_v30 = vpop.permute.xlu0 %558 }
  0x9f   : > { %v561_v28 = vpop.permute.xlu1 %560 }
  0xa2   : > { %v563_v40 = vpop.permute.xlu0 %562 }
  0xa3   : > { %v565_v38 = vpop.permute.xlu1 %564 }
  0xa7   : > { %v569_v48 = vpop.permute.xlu1 %568 }
  0xf2   : > { %v1283_v52 = vpop.f32.mrb[0].mxu0 }
  0xf3   : > { %v405_v53 = vadd.f32 %v1283_v52, %v1948_v51  ;;  %v399_v54 = vpop.f32.mrb[1].mxu0 }
  0xf4   : > { %v400_v56 = vadd.f32 %v1948_v51, %v399_v54 }
  0xf5   : > { %v479_v57 = vmax.f32 %v405_v53, 0.0 }
  0xf6   : > { %v478_v59 = vmax.f32 %v400_v56, 0.0  ;;  %v1286_v60 = vpop.f32.mrb[2].mxu0 }
  0xf7   : > { %495 = vst [vmem:[#allocation2 + $0x8] sm:$0xff] %v479_v57  ;;  %v415_v61 = vadd.f32 %v1286_v60, %v1948_v51  ;;  %v409_v62 = vpop.f32.mrb[3].mxu0 }
  0xf8   : > { %494 = vst [vmem:[#allocation2] sm:$0xff] %v478_v59  ;;  %v410_v63 = vadd.f32 %v1948_v51, %v409_v62  ;;  %592 = vst.msk [vmem:[#allocation2 + $0x8] sm:$0xff] %vm590_vm1, %v545_v58  ;;  %v573_v59 = vpop.permute.xlu1 %572 }
  0xf9   : > { %591 = vst.msk [vmem:[#allocation2] sm:$0xff] %vm590_vm1, %v543_v50  ;;  %v481_v0 = vmax.f32 %v415_v61, 0.0  ;;  %v567_v50 = vpop.permute.xlu0 %566 }
  0xfa   : > { %v480_v2 = vmax.f32 %v410_v63, 0.0  ;;  %v1289_v3 = vpop.f32.mrb[4].mxu0 }
  0xfb   : > { %497 = vst [vmem:[#allocation2 + $0x18] sm:$0xff] %v481_v0  ;;  %v425_v4 = vadd.f32 %v1289_v3, %v1948_v51  ;;  %v419_v5 = vpop.f32.mrb[5].mxu0  ;;  %v819_v3 = vld [vmem:[%s2058_s3 + $0x110] sm:$0xff] }
  0xfc   : > { %496 = vst [vmem:[#allocation2 + $0x10] sm:$0xff] %v480_v2  ;;  %594 = vst.msk [vmem:[#allocation2 + $0x18] sm:$0xff] %vm590_vm1, %v549_v1  ;;  %v420_v6 = vadd.f32 %v1948_v51, %v419_v5 }
  0xfd   : > { %593 = vst.msk [vmem:[#allocation2 + $0x10] sm:$0xff] %vm590_vm1, %v547_v55  ;;  %v483_v7 = vmax.f32 %v425_v4, 0.0  ;;  %v571_v61 = vpop.permute.xlu0 %570  ;;  %v820_v4 = vld [vmem:[%s2058_s3 + $0x118] sm:$0xff] }
  0xfe   : > { %v482_v9 = vmax.f32 %v420_v6, 0.0  ;;  %v1292_v13 = vpop.f32.mrb[6].mxu0  ;;  %v1516_v5 = vpack.c.bf16 %v820_v4, %v819_v3  ;;  %v1173_v6 = vld [vmem:[%s2058_s3 + $0x98] ss:$0 sm:$0xff] }
  0xff   : > { %499 = vst [vmem:[#allocation2 + $0x28] sm:$0xff] %v483_v7  ;;  %v608_v14 = vld [vmem:[#allocation2 + $0x8] sm:$0xff]  ;;  %v435_v15 = vadd.f32 %v1292_v13, %v1948_v51  ;;  %v429_v16 = vpop.f32.mrb[7].mxu0 }
 0x100   : > { %498 = vst [vmem:[#allocation2 + $0x20] sm:$0xff] %v482_v9  ;;  %v607_v11 = vld [vmem:[#allocation2] sm:$0xff]  ;;  %596 = vst.msk [vmem:[#allocation2 + $0x28] sm:$0xff] %vm590_vm1, %v553_v8  ;;  %v430_v17 = vadd.f32 %v1948_v51, %v429_v16  ;;  %1517 = vmatprep.subr.bf16.mxu0 %v1516_v5 }
 0x101   : > { %1337 = vmatprep.mubr.f32.mxu1 %v607_v11  ;;  %595 = vst.msk [vmem:[#allocation2 + $0x20] sm:$0xff] %vm590_vm1, %v551_v10  ;;  %v485_v18 = vmax.f32 %v435_v15, 0.0  ;;  %1519 = vmatpush3.bf16.msra.mxu0 %v1516_v5 }
 0x102   : > { %1338 = vmatmul.mubr.f32.vlgmr.msra.gmra.mrb[0].mxu1 %v608_v14  ;;  %v484_v19 = vmax.f32 %v430_v17, 0.0  ;;  %v1295_v21 = vpop.f32.mrb[8].mxu0 }
 0x103   : > { %501 = vst [vmem:[#allocation2 + $0x38] sm:$0xff] %v485_v18  ;;  %v610_v22 = vld [vmem:[#allocation2 + $0x18] sm:$0xff]  ;;  %v445_v23 = vadd.f32 %v1295_v21, %v1948_v51  ;;  %v439_v24 = vpop.f32.mrb[9].mxu0 }
 0x104   : > { %v609_v25 = vld [vmem:[#allocation2 + $0x10] sm:$0xff]  ;;  %500 = vst [vmem:[#allocation2 + $0x30] sm:$0xff] %v484_v19  ;;  %598 = vst.msk [vmem:[#allocation2 + $0x38] sm:$0xff] %vm590_vm1, %v557_v12  ;;  %v440_v26 = vadd.f32 %v1948_v51, %v439_v24 }
 0x105   : > { %1340 = vmatprep.mubr.f32.mxu1 %v609_v25  ;;  %597 = vst.msk [vmem:[#allocation2 + $0x30] sm:$0xff] %vm590_vm1, %v555_v20  ;;  %v487_v27 = vmax.f32 %v445_v23, 0.0 }
 0x106   : > { %1341 = vmatmul.mubr.f32.gmra.mrb[2].mxu1 %v610_v22  ;;  %v486_v29 = vmax.f32 %v440_v26, 0.0  ;;  %v1298_v31 = vpop.f32.mrb[10].mxu0 }
 0x107   : > { %503 = vst [vmem:[#allocation2 + $0x48] sm:$0xff] %v487_v27  ;;  %v612_v32 = vld [vmem:[#allocation2 + $0x28] sm:$0xff]  ;;  %v455_v33 = vadd.f32 %v1298_v31, %v1948_v51  ;;  %v449_v34 = vpop.f32.mrb[11].mxu0 }
 0x108   : > { %v611_v35 = vld [vmem:[#allocation2 + $0x20] sm:$0xff]  ;;  %502 = vst [vmem:[#allocation2 + $0x40] sm:$0xff] %v486_v29  ;;  %600 = vst.msk [vmem:[#allocation2 + $0x48] sm:$0xff] %vm590_vm1, %v561_v28  ;;  %v450_v36 = vadd.f32 %v1948_v51, %v449_v34 }
 0x109   : > { %1343 = vmatprep.mubr.f32.mxu1 %v611_v35  ;;  %599 = vst.msk [vmem:[#allocation2 + $0x40] sm:$0xff] %vm590_vm1, %v559_v30  ;;  %v489_v37 = vmax.f32 %v455_v33, 0.0 }
 0x10a   : > { %1344 = vmatmul.mubr.f32.gmra.mrb[4].mxu1 %v612_v32  ;;  %v488_v39 = vmax.f32 %v450_v36, 0.0  ;;  %v1301_v41 = vpop.f32.mrb[12].mxu0 }
 0x10b   : > { %505 = vst [vmem:[#allocation2 + $0x58] sm:$0xff] %v489_v37  ;;  %v614_v42 = vld [vmem:[#allocation2 + $0x38] sm:$0xff]  ;;  %v465_v43 = vadd.f32 %v1301_v41, %v1948_v51  ;;  %v459_v44 = vpop.f32.mrb[13].mxu0 }
 0x10c   : > { %v613_v45 = vld [vmem:[#allocation2 + $0x30] sm:$0xff]  ;;  %504 = vst [vmem:[#allocation2 + $0x50] sm:$0xff] %v488_v39  ;;  %602 = vst.msk [vmem:[#allocation2 + $0x58] sm:$0xff] %vm590_vm1, %v565_v38  ;;  %v460_v46 = vadd.f32 %v1948_v51, %v459_v44 }
 0x10d   : > { %1346 = vmatprep.mubr.f32.mxu1 %v613_v45  ;;  %601 = vst.msk [vmem:[#allocation2 + $0x50] sm:$0xff] %vm590_vm1, %v563_v40  ;;  %v491_v47 = vmax.f32 %v465_v43, 0.0 }
 0x10e   : > { %1347 = vmatmul.mubr.f32.gmra.mrb[6].mxu1 %v614_v42  ;;  %v490_v49 = vmax.f32 %v460_v46, 0.0  ;;  %v1304_v52 = vpop.f32.mrb[14].mxu0 }
 0x10f   : > { %507 = vst [vmem:[#allocation2 + $0x68] sm:$0xff] %v491_v47  ;;  %v616_v53 = vld [vmem:[#allocation2 + $0x48] sm:$0xff]  ;;  %v475_v54 = vadd.f32 %v1304_v52, %v1948_v51  ;;  %v469_v55 = vpop.f32.mrb[15].mxu0 }
 0x110   : > { %v615_v56 = vld [vmem:[#allocation2 + $0x40] sm:$0xff]  ;;  %506 = vst [vmem:[#allocation2 + $0x60] sm:$0xff] %v490_v49  ;;  %604 = vst.msk [vmem:[#allocation2 + $0x68] sm:$0xff] %vm590_vm1, %v569_v48  ;;  %v470_v57 = vadd.f32 %v1948_v51, %v469_v55 }
 0x111   : > { %1349 = vmatprep.mubr.f32.mxu1 %v615_v56  ;;  %603 = vst.msk [vmem:[#allocation2 + $0x60] sm:$0xff] %vm590_vm1, %v567_v50  ;;  %v493_v58 = vmax.f32 %v475_v54, 0.0  ;;  %v1654_v56 = vmov 0.0|0.0  }
 0x112   : > { %1350 = vmatmul.mubr.f32.gmra.mrb[8].mxu1 %v616_v53  ;;  %v492_v60 = vmax.f32 %v470_v57, 0.0  ;;  %1520 = vmatprep.subr.bf16.mxu1 %v1654_v56  ;;  %v1656_v57 = vmov 0.0  }
 0x113   : > { %509 = vst [vmem:[#allocation2 + $0x78] sm:$0xff] %v493_v58  ;;  %v618_v62 = vld [vmem:[#allocation2 + $0x58] sm:$0xff]  ;;  %v1058_v58 = vld [vmem:[%s2058_s3 + $0x130] sm:$0x1] }
 0x114   : > { %v617_v63 = vld [vmem:[#allocation2 + $0x50] sm:$0xff]  ;;  %508 = vst [vmem:[#allocation2 + $0x70] sm:$0xff] %v492_v60  ;;  %606 = vst.msk [vmem:[#allocation2 + $0x78] sm:$0xff] %vm590_vm1, %v573_v59  ;;  %v1657_v59 = vmov 0   ;;  %v1174_v60 = vld [vmem:[%s2058_s3 + $0x120] ss:$0 sm:$0xff] }
 0x115   : > { %1352 = vmatprep.mubr.f32.mxu1 %v617_v63  ;;  %605 = vst.msk [vmem:[#allocation2 + $0x70] sm:$0xff] %vm590_vm1, %v571_v61  ;;  %1588 = vset.pattern.permute.xlu0 %v1657_v59 }
 0x116   : > { %1353 = vmatmul.mubr.f32.gmra.mrb[10].mxu1 %v618_v62  ;;  %1061 = vperm.xlu0 %1588, %v1058_v58  }
 0x117   : > { %v620_v0 = vld [vmem:[#allocation2 + $0x68] sm:$0xff] }
 0x118   : > { %v619_v51 = vld [vmem:[#allocation2 + $0x60] sm:$0xff] }
 0x119   : > { %1355 = vmatprep.mubr.f32.mxu1 %v619_v51 }
 0x11a   : > { %1356 = vmatmul.mubr.f32.gmra.mrb[12].mxu1 %v620_v0 }
 0x11b   : > { %v622_v1 = vld [vmem:[#allocation2 + $0x78] sm:$0xff] }
 0x11c   : > { %v621_v2 = vld [vmem:[#allocation2 + $0x70] sm:$0xff] }
 0x11d   : > { %1358 = vmatprep.mubr.f32.mxu1 %v621_v2 }
 0x11e   : > { %1359 = vmatmul.mubr.f32.gmra.mrb[14].mxu1 %v622_v1 }
 0x11f   : > { %1449 = vmatprep.mubr.msk.f32.mxu1 %vm1655_vm2, %v1656_v57 }
 0x1d5   : > { %v1339_v7 = vpop.f32.mrb[0].mxu1 }
 0x1d6   : > { %v716_v8 = vadd.f32 %v1339_v7, %v1173_v6  ;;  %v710_v9 = vpop.f32.mrb[1].mxu1 }
 0x1d7   : > { %v711_v10 = vadd.f32 %v1173_v6, %v710_v9 }
 0x1d8   : > { %v790_v15 = vmax.f32 %v716_v8, 0.0 }
 0x1d9   : > { %v789_v13 = vmax.f32 %v711_v10, 0.0  ;;  %v1342_v14 = vpop.f32.mrb[2].mxu1 }
 0x1da   : > { %v726_v16 = vadd.f32 %v1342_v14, %v1173_v6  ;;  %v720_v11 = vpop.f32.mrb[3].mxu1 }
 0x1db   : > { %v721_v17 = vadd.f32 %v1173_v6, %v720_v11  ;;  %1393 = vmatprep.mubr.f32.mxu0 %v789_v13 }
 0x1dc   : > { %v792_v18 = vmax.f32 %v726_v16, 0.0  ;;  %1394 = vmatmul.mubr.f32.vlgmr.msra.gmra.mrb[16].mxu0 %v790_v15 }
 0x1dd   : > { %v791_v12 = vmax.f32 %v721_v17, 0.0  ;;  %v1345_v19 = vpop.f32.mrb[4].mxu1 }
 0x1de   : > { %v736_v20 = vadd.f32 %v1345_v19, %v1173_v6  ;;  %v730_v21 = vpop.f32.mrb[5].mxu1 }
 0x1df   : > { %1396 = vmatprep.mubr.f32.mxu0 %v791_v12  ;;  %v731_v22 = vadd.f32 %v1173_v6, %v730_v21 }
 0x1e0   : > { %1397 = vmatmul.mubr.f32.gmra.mrb[18].mxu0 %v792_v18  ;;  %v794_v23 = vmax.f32 %v736_v20, 0.0 }
 0x1e1   : > { %v793_v24 = vmax.f32 %v731_v22, 0.0  ;;  %v1348_v25 = vpop.f32.mrb[6].mxu1 }
 0x1e2   : > { %v746_v26 = vadd.f32 %v1348_v25, %v1173_v6  ;;  %v740_v27 = vpop.f32.mrb[7].mxu1 }
 0x1e3   : > { %1399 = vmatprep.mubr.f32.mxu0 %v793_v24  ;;  %v741_v28 = vadd.f32 %v1173_v6, %v740_v27 }
 0x1e4   : > { %1400 = vmatmul.mubr.f32.gmra.mrb[20].mxu0 %v794_v23  ;;  %v796_v29 = vmax.f32 %v746_v26, 0.0 }
 0x1e5   : > { %v795_v30 = vmax.f32 %v741_v28, 0.0  ;;  %v1351_v31 = vpop.f32.mrb[8].mxu1 }
 0x1e6   : > { %v756_v32 = vadd.f32 %v1351_v31, %v1173_v6  ;;  %v750_v33 = vpop.f32.mrb[9].mxu1 }
 0x1e7   : > { %1402 = vmatprep.mubr.f32.mxu0 %v795_v30  ;;  %v751_v34 = vadd.f32 %v1173_v6, %v750_v33 }
 0x1e8   : > { %1403 = vmatmul.mubr.f32.gmra.mrb[22].mxu0 %v796_v29  ;;  %v798_v35 = vmax.f32 %v756_v32, 0.0 }
 0x1e9   : > { %v797_v36 = vmax.f32 %v751_v34, 0.0  ;;  %v1354_v37 = vpop.f32.mrb[10].mxu1 }
 0x1ea   : > { %v766_v38 = vadd.f32 %v1354_v37, %v1173_v6  ;;  %v760_v39 = vpop.f32.mrb[11].mxu1 }
 0x1eb   : > { %1405 = vmatprep.mubr.f32.mxu0 %v797_v36  ;;  %v761_v40 = vadd.f32 %v1173_v6, %v760_v39 }
 0x1ec   : > { %1406 = vmatmul.mubr.f32.gmra.mrb[24].mxu0 %v798_v35  ;;  %v800_v41 = vmax.f32 %v766_v38, 0.0 }
 0x1ed   : > { %v799_v42 = vmax.f32 %v761_v40, 0.0  ;;  %v1357_v43 = vpop.f32.mrb[12].mxu1 }
 0x1ee   : > { %v776_v44 = vadd.f32 %v1357_v43, %v1173_v6  ;;  %v770_v45 = vpop.f32.mrb[13].mxu1 }
 0x1ef   : > { %1408 = vmatprep.mubr.f32.mxu0 %v799_v42  ;;  %v771_v46 = vadd.f32 %v1173_v6, %v770_v45 }
 0x1f0   : > { %1409 = vmatmul.mubr.f32.gmra.mrb[26].mxu0 %v800_v41  ;;  %v802_v47 = vmax.f32 %v776_v44, 0.0 }
 0x1f1   : > { %v801_v48 = vmax.f32 %v771_v46, 0.0  ;;  %v1360_v49 = vpop.f32.mrb[14].mxu1 }
 0x1f2   : > { %v786_v50 = vadd.f32 %v1360_v49, %v1173_v6  ;;  %v780_v52 = vpop.f32.mrb[15].mxu1 }
 0x1f3   : > { %1411 = vmatprep.mubr.f32.mxu0 %v801_v48  ;;  %v781_v53 = vadd.f32 %v1173_v6, %v780_v52 }
 0x1f4   : > { %1412 = vmatmul.mubr.f32.gmra.mrb[28].mxu0 %v802_v47  ;;  %v804_v54 = vmax.f32 %v786_v50, 0.0 }
 0x1f5   : > { %v803_v55 = vmax.f32 %v781_v53, 0.0  ;;  %v987_v53 = vld [vmem:[%s2058_s3 + $0x128] sm:$0xff] }
 0x1f7   : > { %1414 = vmatprep.mubr.f32.mxu0 %v803_v55 }
 0x1f8   : > { %1415 = vmatmul.mubr.f32.gmra.mrb[30].mxu0 %v804_v54  ;;  %v1062_v54 = vpop.permute.xlu0 %1061 }
 0x2af   : > { %v1395_v61 = vpop.f32.mrb[16].mxu0 }
 0x2b0   : > { %v898_v62 = vadd.f32 %v1395_v61, %v1174_v60  ;;  %v892_v63 = vpop.f32.mrb[17].mxu0 }
 0x2b1   : > { %v893_v0 = vadd.f32 %v1174_v60, %v892_v63 }
 0x2b2   : > { %v972_v51 = vmax.f32 %v898_v62, 0.0 }
 0x2b3   : > { %v971_v1 = vmax.f32 %v893_v0, 0.0  ;;  %v1398_v2 = vpop.f32.mrb[18].mxu0 }
 0x2b4   : > { %v908_v3 = vadd.f32 %v1398_v2, %v1174_v60  ;;  %v902_v4 = vpop.f32.mrb[19].mxu0 }
 0x2b5   : > { %v1521_v5 = vpack.c.bf16 %v972_v51, %v971_v1  ;;  %v903_v6 = vadd.f32 %v1174_v60, %v902_v4 }
 0x2b6   : > { %v974_v7 = vmax.f32 %v908_v3, 0.0 }
 0x2b7   : > { %v973_v8 = vmax.f32 %v903_v6, 0.0  ;;  %1522 = vmatpush3.bf16.xpose.msra.mxu1 %v1521_v5  ;;  %v1401_v9 = vpop.f32.mrb[20].mxu0 }
 0x2b8   : > { %v918_v10 = vadd.f32 %v1401_v9, %v1174_v60  ;;  %v912_v13 = vpop.f32.mrb[21].mxu0  ;;  %1523 = vmatprep.subr.bf16.mxu1 %v1654_v56 }
 0x2b9   : > { %v1524_v14 = vpack.c.bf16 %v974_v7, %v973_v8  ;;  %v913_v15 = vadd.f32 %v1174_v60, %v912_v13 }
 0x2ba   : > { %v976_v16 = vmax.f32 %v918_v10, 0.0 }
 0x2bb   : > { %v975_v11 = vmax.f32 %v913_v15, 0.0  ;;  %v1404_v17 = vpop.f32.mrb[22].mxu0 }
 0x2bc   : > { %v928_v18 = vadd.f32 %v1404_v17, %v1174_v60  ;;  %v922_v12 = vpop.f32.mrb[23].mxu0 }
 0x2bd   : > { %v1527_v19 = vpack.c.bf16 %v976_v16, %v975_v11  ;;  %v923_v20 = vadd.f32 %v1174_v60, %v922_v12 }
 0x2be   : > { %v978_v21 = vmax.f32 %v928_v18, 0.0 }
 0x2bf   : > { %1525 = vmatpush3.bf16.xpose.msra.mxu1 %v1524_v14  ;;  %v977_v22 = vmax.f32 %v923_v20, 0.0  ;;  %v1407_v23 = vpop.f32.mrb[24].mxu0 }
 0x2c0   : > { %1526 = vmatprep.subr.bf16.mxu1 %v1654_v56  ;;  %v938_v24 = vadd.f32 %v1407_v23, %v1174_v60  ;;  %v932_v25 = vpop.f32.mrb[25].mxu0 }
 0x2c1   : > { %v1530_v26 = vpack.c.bf16 %v978_v21, %v977_v22  ;;  %v933_v27 = vadd.f32 %v1174_v60, %v932_v25 }
 0x2c2   : > { %v980_v28 = vmax.f32 %v938_v24, 0.0 }
 0x2c3   : > { %v979_v29 = vmax.f32 %v933_v27, 0.0  ;;  %v1410_v30 = vpop.f32.mrb[26].mxu0 }
 0x2c4   : > { %v948_v31 = vadd.f32 %v1410_v30, %v1174_v60  ;;  %v942_v32 = vpop.f32.mrb[27].mxu0 }
 0x2c5   : > { %v1533_v33 = vpack.c.bf16 %v980_v28, %v979_v29  ;;  %v943_v34 = vadd.f32 %v1174_v60, %v942_v32 }
 0x2c6   : > { %v982_v35 = vmax.f32 %v948_v31, 0.0 }
 0x2c7   : > { %1528 = vmatpush3.bf16.xpose.msra.mxu1 %v1527_v19  ;;  %v981_v36 = vmax.f32 %v943_v34, 0.0  ;;  %v1413_v37 = vpop.f32.mrb[28].mxu0 }
 0x2c8   : > { %1529 = vmatprep.subr.bf16.mxu1 %v1654_v56  ;;  %v958_v38 = vadd.f32 %v1413_v37, %v1174_v60  ;;  %v952_v39 = vpop.f32.mrb[29].mxu0 }
 0x2c9   : > { %v1536_v40 = vpack.c.bf16 %v982_v35, %v981_v36  ;;  %v953_v41 = vadd.f32 %v1174_v60, %v952_v39 }
 0x2ca   : > { %v984_v42 = vmax.f32 %v958_v38, 0.0 }
 0x2cb   : > { %v983_v43 = vmax.f32 %v953_v41, 0.0  ;;  %v1416_v44 = vpop.f32.mrb[30].mxu0 }
 0x2cc   : > { %v968_v45 = vadd.f32 %v1416_v44, %v1174_v60  ;;  %v962_v46 = vpop.f32.mrb[31].mxu0 }
 0x2cd   : > { %v1539_v47 = vpack.c.bf16 %v984_v42, %v983_v43  ;;  %v963_v48 = vadd.f32 %v1174_v60, %v962_v46 }
 0x2ce   : > { %v986_v49 = vmax.f32 %v968_v45, 0.0 }
 0x2cf   : > { %1531 = vmatpush3.bf16.xpose.msra.mxu1 %v1530_v26  ;;  %v985_v50 = vmax.f32 %v963_v48, 0.0 }
 0x2d0   : > { %1532 = vmatprep.subr.bf16.mxu1 %v1654_v56 }
 0x2d1   : > { %v1542_v52 = vpack.c.bf16 %v986_v49, %v985_v50 }
 0x2d7   : > { %1534 = vmatpush3.bf16.xpose.msra.mxu1 %v1533_v33 }
 0x2d8   : > { %1535 = vmatprep.subr.bf16.mxu1 %v1654_v56 }
 0x2df   : > { %1537 = vmatpush3.bf16.xpose.msra.mxu1 %v1536_v40 }
 0x2e0   : > { %1538 = vmatprep.subr.bf16.mxu1 %v1654_v56 }
 0x2e7   : > { %1540 = vmatpush3.bf16.xpose.msra.mxu1 %v1539_v47 }
 0x2e8   : > { %1541 = vmatprep.subr.bf16.mxu1 %v1654_v56 }
 0x2ef   : > { %1543 = vmatpush3.bf16.xpose.msra.mxu1 %v1542_v52 }
 0x2f6   : > { %1450 = vmatmul.mubr.f32.vlgmr.msra.gmra.mrb[16].mxu1 %v987_v53 }
 0x3c9   : > { %v1054_v55 = vpop.f32.mrb[16].mxu1 }
 0x3ca   : > { %v1064_v57 = vadd.f32 %v1062_v54, %v1054_v55  ;;  %v1451_v58 = vpop.f32.mrb[17].mxu1 }
 0x3cc   : > { %1065 = vst [vmem:[%s206_s9] sm:$0x1] %v1064_v57 }
 0x3cd   : > { %1602 = shalt.err (!%p1599_p3)
}
 0x3ce   : > { %s1603_s5 = scalar_lea.hbm %s2013_s13, 16  ;;  %s1607_s29 = scalar_lea.hbm %s2059_s4, 32 }
 0x3cf   : > { %p1604_p4 = scmp.ne.s32.totalorder %s2013_s13, %s1603_s5  ;;  %p1608_p9 = scmp.lt.u32.totalorder %s2013_s13, %s2059_s4 }
 0x3d0   : > { %p1609_p10 = scmp.lt.u32.totalorder %s1607_s29, %s1603_s5  ;;  %p1611_p12 = scmp.lt.u32.totalorder %s1603_s5, %s2013_s13 }
 0x3d1   : > { %p1605_p7 = pnand %p1604_p4, %p1719_p5 }
 0x3d2   : > { %p1610_p11 = por %p1609_p10, %p1608_p9 }
 0x3d3   : > { %p1606_p8 = pneg %p1605_p7 }
 0x3d4   : > { %p1612_p13 = por %p1611_p12, %p1610_p11 }
 0x3d6   : > { %p1613_p0 = pnand %p1612_p13, %p1606_p8 }
 0x3d8   : > { %1616 = shalt.err (!%p1613_p0)
}
 0x3d9   : > { %1544 = dma.vmem_to_hbm [thread:$0]  (%p1719_p5), %s2015_s10, 16, %s2013_s13, %s1067_s14  }
 0x3da PF: > { %p1550_p1 = scmp.ge.s32.totalorder %s1651_s18, 2  ;;  %s1091_s7 = sand.u32 1, %s1639_s15  }
 0x3db   : > { %s1092_s8 = scalar_lea.sflag [#allocation4], %s1091_s7 }
 0x3dc   : > { %p1547_p2 = pnand %p1550_p1, %p1723_p6 }
 0x3de   : > { %1634 = dma.done.wait (!%p1547_p2), %s1092_s8, 16  }
 0x3df   : > { %1636 = vsyncadd (!%p1547_p2), %s1092_s8, 4294967280  ;;  %p14_p3 = scmp.ge.s32.totalorder %s1707_s21, 4   ;;  %s2062_s15 = smov %s1643_s16 }
 0x3e0   : > { %s2063_s16 = smov %s1647_s17  ;;  %s2064_s17 = smov %s1717_s24 }
 0x3e1   : > { %s2065_s18 = smov %s1707_s21  ;;  %16 = sbr.rel (!%p14_p3) target bundleno = 3 (0x3), region = 74 }
 0x3e8   :  { %1096 = vsyncpa [#allocation4], 1 }
 0x3e9   :  { %1098 = vsyncpa [#allocation4 + $0x1], 1 }

</bundles_post_ra>
